<compile_context>
chip_gen: v5e
topology: v5e:2x2
jax: 0.10.0
libtpu: 0.0.40
codegen_flags: <defaults>
</compile_context>

<pallas_src>
import jax
import jax.numpy as jnp
from jax import lax
from jax.experimental import pallas as pl
from jax.experimental.pallas import tpu as pltpu


# ----------------------------------------------------------------------------- helpers
def _round_up(v, m):
    return ((v + m - 1) // m) * m


def _round_down(v, m):
    return (v // m) * m


def _tpu_vmem_bytes():
    """Per-core VMEM capacity; fall back to the most conservative value (v7x)."""
    try:
        return int(pltpu.get_tpu_info().vmem_capacity_bytes)
    except Exception:
        return 64 << 20


def _choose_tile_d(B, D, itemsize, budget):
    """Pick a lane-dense feature tile.

    Returns 0 when even a 128-wide column block of the full batch blows the
    VMEM budget -> caller must use the streaming (batch-tiled) fallback.
    """
    # bytes per feature column: double-buffered input + output blocks + f32 weight row
    per_col = 4 * B * itemsize + 8
    if D <= 128:
        return D if per_col * D <= budget else 0
    d_ceil = _round_up(D, 128)
    max_by_budget = _round_down(budget // per_col, 128)
    if max_by_budget < 128:
        return 0
    # grow toward a ~4 MiB input block; never shrink below 512 unless forced
    target = _round_down((4 << 20) // max(B * itemsize, 1), 128)
    tile = max(512, target)
    # guarantee >= 2 grid tiles so v7x's two TensorCores split the feature axis
    tile_half = _round_up(pl.cdiv(d_ceil, 2), 128)
    tile = min(tile, max_by_budget, tile_half, d_ceil)
    return max(tile, 128)


# ----------------------------------------------------------------------------- resident-batch kernel
def actnorm_direct_kernel(x_ref, y_ref, w_ref):
    """Whole batch resident in VMEM for this feature tile.

    Two-pass stats (mean, then centered second moment) for numerical parity
    with torch.std / jnp.std; both walks are over the VMEM-resident block so
    the cost is hidden under the HBM DMA (f32 VALU/vld slots have slack; only
    bf16 huge-B on v7x approaches slot saturation).
    """
    x = x_ref[...].astype(jnp.float32)            # (B, TILE_D)
    B = x.shape[0]
    # B == 1 guard: reference unbiased std is NaN; we return scale = 1/eps instead.
    denom = float(B - 1) if B > 1 else 1.0

    mean = jnp.sum(x, axis=0, keepdims=True) * (1.0 / B)     # (1, TILE_D)
    centered = x - mean
    var = jnp.sum(centered * centered, axis=0, keepdims=True) * (1.0 / denom)
    std = jnp.sqrt(var)

    scale = 1.0 / (std + 1e-12)                   # == exp(weight), exact division
    weight = jnp.log(scale)                       # only needed for logdet

    y_ref[...] = (centered * scale).astype(y_ref.dtype)
    w_ref[...] = weight.astype(w_ref.dtype)       # lane-dense (1, TILE_D) row


def _actnorm_forward_resident(x, tile_d, vmem_cap):
    B, D = x.shape
    out_dtype = x.dtype
    itemsize = jnp.dtype(out_dtype).itemsize
    grid_d = pl.cdiv(D, tile_d)

    # double-buffered in + out blocks + weight row
    footprint = 4 * B * tile_d * itemsize + 8 * tile_d
    vmem_limit = int(min(max(int(1.5 * footprint), 16 << 20), int(0.6 * vmem_cap)))

    # Deeper buffering only helps when per-block compute is tiny (forced-small blocks).
    small_block = (B * tile_d * itemsize) < (256 << 10)
    if small_block and grid_d >= 4:
        x_spec = pl.BlockSpec((B, tile_d), lambda j: (0, j), pipeline_mode=pl.Buffered(3))
    else:
        x_spec = pl.BlockSpec((B, tile_d), lambda j: (0, j))

    y, w = pl.pallas_call(
        actnorm_direct_kernel,
        out_shape=(
            jax.ShapeDtypeStruct((B, D), out_dtype),
            jax.ShapeDtypeStruct((1, D), jnp.float32),
        ),
        grid_spec=pl.GridSpec(
            grid=(grid_d,),
            in_specs=[x_spec],
            out_specs=(
                pl.BlockSpec((B, tile_d), lambda j: (0, j)),
                pl.BlockSpec((1, tile_d), lambda j: (0, j)),
            ),
        ),
        compiler_params=pltpu.CompilerParams(
            dimension_semantics=("parallel",),
            vmem_limit_bytes=vmem_limit,
        ),
    )(x)

    # logdet = sum(weight) broadcast over batch; boundary-tile garbage columns
    # were never written (OOB stores dropped), so w is exactly (1, D) of valid data.
    logdet_scalar = jnp.sum(w, axis=-1, keepdims=True)        # (1, 1)
    logdet = jnp.broadcast_to(logdet_scalar.astype(out_dtype), (B, 1))
    return y, logdet


# ----------------------------------------------------------------------------- streaming fallback (huge B)
def _streaming_tiles(B, D, itemsize, budget):
    d_ceil = _round_up(D, 128)
    tile_d = D if D <= 128 else min(512, d_ceil)
    tb = _round_down(max(budget // (4 * tile_d * itemsize), 8), 8)
    tb = max(8, min(tb, 1024, _round_up(B, 8)))
    return tb, tile_d


def _actnorm_forward_streaming(x, budget, vmem_cap):
    """Two-kernel path for batches too large to keep resident in VMEM.

    Pass 1: batch-tiled accumulation of sum(x), sum(x*x) per feature
            (feature axis parallel, batch axis 'arbitrary' with accumulator
            outputs resident across it).
    Pass 2: elementwise affine (x - mean) * scale.
    Note: the streaming stats use the one-pass E[x^2]-mean^2 form to keep HBM
    traffic at 2 reads + 1 write of x; slight cancellation risk vs. the
    two-pass reference for |mean| >> std.
    """
    B, D = x.shape
    out_dtype = x.dtype
    itemsize = jnp.dtype(out_dtype).itemsize
    tb, tile_d = _streaming_tiles(B, D, itemsize, budget)
    n_b = pl.cdiv(B, tb)
    n_d = pl.cdiv(D, tile_d)

    def stats_kernel(x_ref, s1_ref, s2_ref):
        b = pl.program_id(1)

        @pl.when(b == 0)
        def _():
            s1_ref[...] = jnp.zeros_like(s1_ref)
            s2_ref[...] = jnp.zeros_like(s2_ref)

        xv = x_ref[...].astype(jnp.float32)                    # (tb, tile_d)
        rows = lax.broadcasted_iota(jnp.int32, xv.shape, 0)
        valid = rows < (B - b * tb)                            # mask ragged last batch tile
        xm = jnp.where(valid, xv, 0.0)
        s1_ref[...] += jnp.sum(xm, axis=0, keepdims=True)
        s2_ref[...] += jnp.sum(xm * xm, axis=0, keepdims=True)

    stats_bytes = 2 * tb * tile_d * itemsize + 4 * tile_d * 4
    aff_bytes = 4 * tb * tile_d * itemsize + 4 * tile_d * 4
    vmem_limit = int(min(max(2 * max(stats_bytes, aff_bytes), 16 << 20), int(0.6 * vmem_cap)))

    s1, s2 = pl.pallas_call(
        stats_kernel,
        out_shape=(
            jax.ShapeDtypeStruct((1, D), jnp.float32),
            jax.ShapeDtypeStruct((1, D), jnp.float32),
        ),
        grid_spec=pl.GridSpec(
            grid=(n_d, n_b),
            in_specs=[pl.BlockSpec((tb, tile_d), lambda j, b: (b, j))],
            out_specs=(
                pl.BlockSpec((1, tile_d), lambda j, b: (0, j)),
                pl.BlockSpec((1, tile_d), lambda j, b: (0, j)),
            ),
        ),
        compiler_params=pltpu.CompilerParams(
            dimension_semantics=("parallel", "arbitrary"),
            vmem_limit_bytes=vmem_limit,
        ),
    )(x)

    denom = float(B - 1) if B > 1 else 1.0
    mean = s1 * (1.0 / B)
    var = jnp.maximum((s2 - B * mean * mean) * (1.0 / denom), 0.0)
    std = jnp.sqrt(var)
    scale = 1.0 / (std + 1e-12)
    weight = jnp.log(scale)                                    # (1, D) tiny

    def affine_kernel(x_ref, mean_ref, scale_ref, y_ref):
        xv = x_ref[...].astype(jnp.float32)
        y_ref[...] = ((xv - mean_ref[...]) * scale_ref[...]).astype(y_ref.dtype)

    y = pl.pallas_call(
        affine_kernel,
        out_shape=jax.ShapeDtypeStruct((B, D), out_dtype),
        grid_spec=pl.GridSpec(
            grid=(n_b, n_d),
            in_specs=[
                pl.BlockSpec((tb, tile_d), lambda i, j: (i, j)),
                pl.BlockSpec((1, tile_d), lambda i, j: (0, j)),
                pl.BlockSpec((1, tile_d), lambda i, j: (0, j)),
            ],
            out_specs=pl.BlockSpec((tb, tile_d), lambda i, j: (i, j)),
        ),
        compiler_params=pltpu.CompilerParams(
            dimension_semantics=("parallel", "parallel"),
            vmem_limit_bytes=vmem_limit,
        ),
    )(x, mean, scale)

    logdet_scalar = jnp.sum(weight, axis=-1, keepdims=True)    # (1, 1)
    logdet = jnp.broadcast_to(logdet_scalar.astype(out_dtype), (B, 1))
    return y, logdet


# ----------------------------------------------------------------------------- public entry point
def actnorm_forward(x):
    """Pallas ActNorm forward (first call, mode='direct').

    Returns (y, logdet) with y: (B, D), logdet: (B, 1).
    """
    B, D = x.shape
    itemsize = jnp.dtype(x.dtype).itemsize
    vmem_cap = _tpu_vmem_bytes()
    # tiling budget: aggressive on 128-MiB VMEM parts (v5e/v6e), conservative on v7x
    budget = min(int(0.4 * vmem_cap), 56 << 20)
    tile_d = _choose_tile_d(B, D, itemsize, budget)
    if tile_d == 0:
        return _actnorm_forward_streaming(x, budget, vmem_cap)
    return _actnorm_forward_resident(x, tile_d, vmem_cap)


# ----------------------------------------------------------------------------- reference
def actnorm_reference(x):
    """Pure-JAX reference mirroring the PyTorch forward (first call, direct)."""
    mean = jnp.mean(x, axis=0)
    std = jnp.std(x, axis=0, ddof=1)
    weight = jnp.log(1.0 / (std + 1e-12))
    bias = mean
    y = (x - bias) * jnp.exp(weight)
    logdet = jnp.broadcast_to(jnp.sum(weight, keepdims=True)[None, :], (x.shape[0], 1))
    return y, logdet


if __name__ == "__main__":
    key = jax.random.PRNGKey(0)

    # --- 1) small shape matching the module (batch=8, num_inputs=32) ---------
    B, D = 8, 32
    x = jax.random.normal(key, (B, D), dtype=jnp.float32) * 2.0 + 0.5
    y, logdet = actnorm_forward(x)
    jax.block_until_ready((y, logdet))
    y_ref, logdet_ref = actnorm_reference(x)
    assert y.shape == (B, D) and logdet.shape == (B, 1)
    assert jnp.allclose(y, y_ref, atol=1e-5, rtol=1e-5)
    assert jnp.allclose(logdet, logdet_ref, atol=1e-5, rtol=1e-5)

    # --- 2) multi-tile feature axis with a ragged boundary block (no padding) -
    k2 = jax.random.PRNGKey(1)
    x2 = jax.random.normal(k2, (16, 384), dtype=jnp.float32) * 1.5 - 0.3
    y2, l2 = actnorm_forward(x2)
    jax.block_until_ready((y2, l2))
    y2r, l2r = actnorm_reference(x2)
    assert jnp.allclose(y2, y2r, atol=1e-5, rtol=1e-5)
    assert jnp.allclose(l2, l2r, atol=1e-4, rtol=1e-5)

    # --- 3) streaming (huge-B) fallback path, exercised at small scale --------
    k3 = jax.random.PRNGKey(2)
    x3 = jax.random.normal(k3, (40, 200), dtype=jnp.float32) * 0.7 + 1.2
    y3, l3 = _actnorm_forward_streaming(x3, budget=64 * 1024, vmem_cap=64 << 20)
    jax.block_until_ready((y3, l3))
    y3r, l3r = actnorm_reference(x3)
    assert jnp.allclose(y3, y3r, atol=1e-4, rtol=1e-4)
    assert jnp.allclose(l3, l3r, atol=1e-3, rtol=1e-4)

    # --- 4) forced small-block regime (deep-buffered input pipeline) ----------
    k4 = jax.random.PRNGKey(3)
    x4 = jax.random.normal(k4, (8, 1024), dtype=jnp.float32)
    y4, l4 = _actnorm_forward_resident(x4, tile_d=128, vmem_cap=64 << 20)
    jax.block_until_ready((y4, l4))
    y4r, l4r = actnorm_reference(x4)
    assert jnp.allclose(y4, y4r, atol=1e-5, rtol=1e-5)
    assert jnp.allclose(l4, l4r, atol=1e-4, rtol=1e-5)

    # TODO(synk): only the 'direct' mode of the first (initializing) forward
    # call is implemented; the stateful `initialized` flag / parameter buffers
    # and the 'inverse' branch live outside the kernel's scope.

    print("KERNEL_OK")
</pallas_src>

<mosaic_0001>
module attributes {stable_mosaic.version = 11 : i64} {
  func.func @actnorm_direct_kernel(%arg0: i32, %arg1: memref<8x32xf32, #tpu.memory_space<vmem>>, %arg2: memref<8x32xf32, #tpu.memory_space<vmem>>, %arg3: memref<1x32xf32, #tpu.memory_space<vmem>>) attributes {dimension_semantics = [#tpu.dimension_semantics<parallel>], iteration_bounds = array<i64: 1>, scalar_prefetch = 0 : i64, scratch_operands = 0 : i64, tpu.core_type = #tpu.core_type<tc>, window_params = [{transform_indices = @transform_0, window_bounds = array<i64: 8, 32>}, {transform_indices = @transform_1, window_bounds = array<i64: 8, 32>}, {transform_indices = @transform_2, window_bounds = array<i64: 1, 32>}]} {
    %c0 = arith.constant 0 : index
    %c0_0 = arith.constant 0 : index
    %0 = vector.load %arg1[%c0, %c0_0] : memref<8x32xf32, #tpu.memory_space<vmem>>, vector<8x32xf32>
    %cst = arith.constant dense<0.000000e+00> : vector<32xf32>
    %1 = vector.multi_reduction <add>, %0, %cst [0] : vector<8x32xf32> to vector<32xf32>
    %2 = vector.shape_cast %1 : vector<32xf32> to vector<1x32xf32>
    %cst_1 = arith.constant 1.250000e-01 : f32
    %3 = vector.broadcast %cst_1 : f32 to vector<1x32xf32>
    %4 = arith.mulf %2, %3 : vector<1x32xf32>
    %5 = vector.broadcast %4 : vector<1x32xf32> to vector<8x32xf32>
    %6 = arith.subf %0, %5 : vector<8x32xf32>
    %7 = arith.mulf %6, %6 : vector<8x32xf32>
    %cst_2 = arith.constant dense<0.000000e+00> : vector<32xf32>
    %8 = vector.multi_reduction <add>, %7, %cst_2 [0] : vector<8x32xf32> to vector<32xf32>
    %9 = vector.shape_cast %8 : vector<32xf32> to vector<1x32xf32>
    %cst_3 = arith.constant 0.142857149 : f32
    %10 = vector.broadcast %cst_3 : f32 to vector<1x32xf32>
    %11 = arith.mulf %9, %10 : vector<1x32xf32>
    %12 = math.sqrt %11 : vector<1x32xf32>
    %cst_4 = arith.constant 9.99999996E-13 : f32
    %13 = vector.broadcast %cst_4 : f32 to vector<1x32xf32>
    %14 = arith.addf %12, %13 : vector<1x32xf32>
    %cst_5 = arith.constant 1.000000e+00 : f32
    %15 = vector.broadcast %cst_5 : f32 to vector<1x32xf32>
    %16 = arith.divf %15, %14 : vector<1x32xf32>
    %17 = math.log %16 : vector<1x32xf32>
    %18 = vector.broadcast %16 : vector<1x32xf32> to vector<8x32xf32>
    %19 = arith.mulf %6, %18 : vector<8x32xf32>
    %c0_6 = arith.constant 0 : index
    %c0_7 = arith.constant 0 : index
    %20 = vector.load %arg2[%c0_6, %c0_7] : memref<8x32xf32, #tpu.memory_space<vmem>>, vector<8x32xf32>
    tpu.vector_store %arg2[%c0_6, %c0_7], %19 {strides = array<i32>} : memref<8x32xf32, #tpu.memory_space<vmem>>, vector<8x32xf32>,
    %c0_8 = arith.constant 0 : index
    %c0_9 = arith.constant 0 : index
    %21 = vector.load %arg3[%c0_8, %c0_9] : memref<1x32xf32, #tpu.memory_space<vmem>>, vector<1x32xf32>
    tpu.vector_store %arg3[%c0_8, %c0_9], %17 {strides = array<i32>} : memref<1x32xf32, #tpu.memory_space<vmem>>, vector<1x32xf32>,
    return
  }
  func.func @transform_0(%arg0: i32) -> (i32, i32) {
    %c0_i32 = arith.constant 0 : i32
    %c0_i32_0 = arith.constant 0 : i32
    return %c0_i32, %arg0 : i32, i32
  }
  func.func @transform_1(%arg0: i32) -> (i32, i32) {
    %c0_i32 = arith.constant 0 : i32
    %c0_i32_0 = arith.constant 0 : i32
    return %c0_i32, %arg0 : i32, i32
  }
  func.func @transform_2(%arg0: i32) -> (i32, i32) {
    %c0_i32 = arith.constant 0 : i32
    %c0_i32_0 = arith.constant 0 : i32
    return %c0_i32, %arg0 : i32, i32
  }
}

</mosaic_0001>

<bundles_post_ra>
// kernel: tpu_custom_call.1
= control target key start
LH: loop header
LB: loop body
LE: loop exit
PB: predicated region body
PF: predicated region fallthrough
CT: control target
= control target key end

     0   :  { %8 = vsyncpa [#allocation3], 0  ;;  %s230_s0 = inlined_call_operand.hbm [shape: f32[8,32], index: 0, kind: input, shape index: {}]   ;;  %s231_s1 = inlined_call_operand.hbm [shape: f32[8,32], index: 1, kind: output, shape index: {0}]   ;;  %s232_s2 = inlined_call_operand.hbm [shape: f32[1,32], index: 2, kind: output, shape index: {1}]  }
   0x1   :  { %9 = vsyncpa [#allocation4], 0 }
   0x2   :  { %10 = vsyncpa [#allocation7], 0  ;;  %s16_s11 = sshll.u32 %s230_s0, 4  ;;  %s200_s12 = smov [#allocation2]   ;;  %s17_s11 = int_to_ptr.hbm [resolvable:$true] %s16_s11 }
   0x3   :  { %s18_s13 = sshll.u32 %s200_s12, 4  ;;  %s19_s13 = int_to_ptr.vmem [resolvable:$true] %s18_s13 }
   0x4   :  { %21 = dma.hbm_to_vmem [thread:$0]  %s17_s11, 128, %s19_s13, [#allocation3]  }
   0x5   :  { %194 = dma.done.wait [#allocation3], 128  }
   0x6   :  { %195 = vsyncadd [#allocation3], 4294967168  ;;  %vm27_vm0 = vcmask 261120   ;;  %v26_v0 = vld [vmem:[#allocation2] sm:$0xff]  ;;  %s201_s0 = smov [#allocation5]   ;;  %s87_s17 = sshll.u32 %s231_s1, 4  ;;  %s88_s17 = int_to_ptr.hbm [resolvable:$true] %s87_s17 }
   0x7   :  { %v28_v1 = vsel %vm27_vm0, %v26_v0, 0.0  ;;  %s85_s14 = sshll.u32 %s201_s0, 4  ;;  %s202_s18 = smov [#allocation6]   ;;  %vm78_vm7 = vcmask 253952   ;;  %s86_s14 = int_to_ptr.vmem [resolvable:$true] %s85_s14 }
   0x8   :  { %v29_v2 = vrot.slane %v28_v1, 4  ;;  %s96_s19 = sshll.u32 %s202_s18, 4  ;;  %s98_s22 = sshll.u32 %s232_s2, 4  ;;  %s97_s19 = int_to_ptr.vmem [resolvable:$true] %s96_s19  ;;  %s99_s22 = int_to_ptr.hbm [resolvable:$true] %s98_s22 }
   0xa   :  { %v30_v3 = vadd.f32 %v29_v2, %v28_v1 }
   0xc   :  { %v31_v4 = vrot.slane %v30_v3, 2 }
   0xe   :  { %v32_v5 = vadd.f32 %v31_v4, %v30_v3 }
  0x10   :  { %v33_v6 = vrot.slane %v32_v5, 1 }
  0x12   :  { %v34_v7 = vadd.f32 %v33_v6, %v32_v5 }
  0x14   :  { %v35_v8 = vmul.f32 0.125, %v34_v7 }
  0x16   :  { %v36_v9 = vsub.f32 %v26_v0, %v35_v8 }
  0x18   :  { %v37_v10 = vmul.f32 %v36_v9, %v36_v9 }
  0x1a   :  { %v38_v11 = vsel %vm27_vm0, %v37_v10, 0.0 }
  0x1b   :  { %v39_v12 = vrot.slane %v38_v11, 4 }
  0x1d   :  { %v40_v13 = vadd.f32 %v39_v12, %v38_v11 }
  0x1f   :  { %v41_v14 = vrot.slane %v40_v13, 2 }
  0x21   :  { %v42_v15 = vadd.f32 %v41_v14, %v40_v13 }
  0x23   :  { %v43_v16 = vrot.slane %v42_v15, 1 }
  0x25   :  { %v44_v17 = vadd.f32 %v43_v16, %v42_v15 }
  0x27   :  { %v45_v18 = vmul.f32 0.14285715, %v44_v17 }
  0x29   :  { %116 = vrsqrt.f32 %v45_v18  ;;  %vm53_vm1 = vcmp.eq.f32.partialorder %v45_v18, inf  ;;  %v56_v25 = vand.u32 2147483648, %v45_v18  ;;  %vm55_vm2 = vcmp.eq.f32.partialorder %v45_v18, 0.0 }
  0x2f   :  { %v117_v19 = vpop.eup %116 }
  0x30   :  { %v47_v20 = vmul.f32 %v117_v19, %v45_v18 }
  0x32   :  { %v48_v21 = vmul.f32 %v117_v19, %v47_v20 }
  0x34   :  { %v49_v22 = vmul.f32 0.5, %v48_v21 }
  0x36   :  { %v50_v23 = vsub.f32 1.5, %v49_v22 }
  0x38   :  { %v51_v24 = vmul.f32 %v117_v19, %v50_v23 }
  0x3a   :  { %v52_v26 = vmul.f32 %v51_v24, %v45_v18 }
  0x3c   :  { %v54_v27 = vsel %vm53_vm1, %v45_v18, %v52_v26 }
  0x3d   :  { %v57_v28 = vsel %vm55_vm2, %v56_v25, %v54_v27 }
  0x3e   :  { %v58_v29 = vadd.f32 1e-12, %v57_v28 }
  0x40   :  { %118 = vrcp.f32 %v58_v29  ;;  %v70_v32 = vand.u32 2147483648, %v58_v29  ;;  %vm64_vm3 = vweird.f32 %v58_v29  ;;  %v68_v34 = vand.u32 2147483647, %v58_v29 }
  0x42   :  { %v71_v36 = vor.u32 1.1754944e-38, %v70_v32  ;;  %vm69_vm6 = vcmp.eq.f32.partialorder %v68_v34, 8.507059e+37 }
  0x46   :  { %v119_v30 = vpop.eup %118 }
  0x47   :  { %v60_v31 = vmul.f32 %v119_v30, %v58_v29  ;;  %vm65_vm4 = vweird.f32 %v119_v30 }
  0x48   :  { %vm66_vm5 = vmor %vm64_vm3, %vm65_vm4 }
  0x49   :  { %v61_v33 = vsub.f32 1.0, %v60_v31 }
  0x4b   :  { %v62_v35 = vmul.f32 %v119_v30, %v61_v33 }
  0x4d   :  { %v63_v37 = vadd.f32 %v119_v30, %v62_v35 }
  0x4f   :  { %v67_v38 = vsel %vm66_vm5, %v119_v30, %v63_v37 }
  0x50   :  { %v72_v39 = vsel %vm69_vm6, %v71_v36, %v67_v38 }
  0x51   :  { %v76_v40 = vmul.f32 %v72_v39, %v36_v9  ;;  %120 = vlog2.f32 %v72_v39 }
  0x53   :  { %77 = vst.msk [vmem:[#allocation5] sm:$0xff] %vm27_vm0, %v76_v40 }
  0x54   :  { %90 = dma.vmem_to_hbm [thread:$0]  %s86_s14, 128, %s88_s17, [#allocation4]  }
  0x57   :  { %v121_v41 = vpop.eup %120 }
  0x58   :  { %v75_v42 = vmul.f32 0.6931472, %v121_v41 }
  0x5a   :  { %79 = vst.msk [vmem:[#allocation6] sm:$0x1] %vm78_vm7, %v75_v42 }
  0x5b   :  { %101 = dma.vmem_to_hbm [thread:$0]  %s97_s19, 16, %s99_s22, [#allocation7]  }
  0x5c   :  { %196 = dma.done.wait [#allocation4], 128  }
  0x5d   :  { %197 = vsyncadd [#allocation4], 4294967168 }
  0x5e   :  { %198 = dma.done.wait [#allocation7], 16  }
  0x5f   :  { %199 = vsyncadd [#allocation7], 4294967280 }
  0x60   :  { %110 = vsyncpa [#allocation3], 1 }
  0x61   :  { %111 = vsyncpa [#allocation4], 1 }
  0x62   :  { %112 = vsyncpa [#allocation7], 1 }

</bundles_post_ra>
